<compile_context>
chip_gen: v7x
topology: tpu7x:2x2x1
jax: 0.10.0
libtpu: 0.0.40
codegen_flags: <defaults>
</compile_context>

<pallas_src>
import functools

import jax
import jax.numpy as jnp
import numpy as np
from jax.experimental import pallas as pl
from jax.experimental.pallas import tpu as pltpu


def _nll_kernel(probs_ref, tgt_ref, sum_ref, cnt_ref, *,
                ignore_index, hw, tn, cps, need_mask):
    s = pl.program_id(0)          # pixel-chunk split (fills v7x's 2nd TensorCore)
    j = pl.program_id(2)          # pixel-chunk index within the split

    @pl.when(j == 0)
    def _init():
        sum_ref[...] = jnp.zeros_like(sum_ref)
        cnt_ref[...] = jnp.zeros_like(cnt_ref)

    p = probs_ref[...]                                  # (BN, C, TN), native dtype
    t = tgt_ref[...].astype(jnp.int32)                  # (BN, 1, TN)
    bn, c, _ = p.shape

    # one-hot gather along the channel (sublane) axis, select in native dtype
    ch = jax.lax.broadcasted_iota(jnp.int32, (bn, c, tn), 1)
    one_hot = ch == t                                   # (BN, C, TN)
    picked = jnp.sum(jnp.where(one_hot, p, jnp.zeros_like(p)),
                     axis=1, keepdims=True)             # (BN, 1, TN)

    # select-then-log: one log per pixel instead of C
    neg_log = -jnp.log(picked.astype(jnp.float32))      # (BN, 1, TN)
    valid = t != ignore_index                           # (BN, 1, TN)

    def accumulate(mask):
        # fold the batch-block axis (elementwise adds of BN tiles), keep lanes
        # wide; accumulators stay resident across the j reduction axis.
        # NOTE: keep jnp.where selects (not multiply-by-mask) so inf/NaN from
        # ignored / out-of-range pixels never reach the accumulators.
        sum_ref[...] += jnp.sum(jnp.where(mask, neg_log, 0.0), axis=0)
        cnt_ref[...] += jnp.sum(jnp.where(mask, 1.0, 0.0), axis=0)

    if need_mask:
        # UNclamped global pixel offset of this chunk (index_map clamps the DMA;
        # masking here guarantees duplicate / ragged-tail lanes contribute 0).
        start = (s * cps + j) * tn
        is_tail = start + tn > hw

        @pl.when(jnp.logical_not(is_tail))
        def _full():
            accumulate(valid)

        @pl.when(is_tail)
        def _tail():
            lane = jax.lax.broadcasted_iota(jnp.int32, valid.shape, 2)
            accumulate(jnp.logical_and(valid, (start + lane) < hw))
    else:
        accumulate(valid)


def _sublanes(dtype):
    # sublane packing: 8 rows for 32-bit, 16 for 16-bit, 32 for 8-bit
    return max(8, 32 // jnp.dtype(dtype).itemsize)


def _round_up(x, m):
    return (x + m - 1) // m * m


def cross_entropy_loss_2d(inputs, targets, *, ignore_index=255, max_tile=262144):
    """inputs: (N, C, H, W) probabilities; targets: (N, H, W) integer class ids."""
    N, C, H, W = inputs.shape
    HW = H * W

    probs = inputs.reshape(N, C, HW)                  # free view of NCHW
    tgt = targets.reshape(N, 1, HW)                   # keep native (possibly narrow) dtype

    # ---- hardware-aware VMEM limit + padded-layout tile accounting ----
    try:
        phys_vmem = int(pltpu.get_tpu_info().vmem_capacity_bytes)
        if phys_vmem <= 0:
            phys_vmem = 64 * 1024 * 1024
    except Exception:
        phys_vmem = 64 * 1024 * 1024                  # conservative (v7x-sized)
    vmem_limit = min(96 * 1024 * 1024, (phys_vmem * 3) // 4)   # 96M on v5e/v6e, 48M on v7x
    budget = (vmem_limit * 3) // 4                    # headroom for compiler scratch

    p_isz = jnp.dtype(inputs.dtype).itemsize
    t_isz = jnp.dtype(targets.dtype).itemsize
    # bytes per pixel lane, double-buffered, with sublane padding:
    img_lane_bytes = (2 * _round_up(C, _sublanes(inputs.dtype)) * p_isz      # probs tile
                      + 2 * _sublanes(targets.dtype) * t_isz)                # target tile
    acc_lane_bytes = 2 * 2 * 8 * 4                    # two f32 (1, tn) resident accumulators

    cap = budget // (img_lane_bytes + acc_lane_bytes)
    cap = max(128, min(max_tile, (cap // 128) * 128))

    # ---- pick pixel tile (tn) and images-per-step (BN) ----
    if HW > cap:
        BN = 1
        k = pl.cdiv(HW, cap)                                   # minimum #chunks
        tn = min(cap, _round_up(pl.cdiv(HW, k), 128))          # near-divisor of HW
    else:
        tn = HW                                                # whole image per block
        BN = 1
        for d in range(N, 0, -1):                              # largest divisor of N that fits
            if N % d:
                continue
            if (d * img_lane_bytes + acc_lane_bytes) * tn <= budget and d * tn <= max_tile:
                BN = d
                break

    num_batch_blocks = N // BN
    num_chunks = pl.cdiv(HW, tn)

    # fill the 2nd TensorCore (v7x) when the batch axis alone can't
    n_split = 2 if (num_batch_blocks == 1 and num_chunks >= 2) else 1
    cps = pl.cdiv(num_chunks, n_split)                # chunks per split
    need_mask = n_split * cps * tn > HW               # ragged tail and/or ragged split
    clamp = n_split * cps > num_chunks                # DMA index clamp for the ragged split

    def chunk_of(s, j):
        g = s * cps + j
        return jnp.minimum(g, num_chunks - 1) if clamp else g

    kernel = functools.partial(_nll_kernel, ignore_index=ignore_index,
                               hw=HW, tn=tn, cps=cps, need_mask=need_mask)

    sum_part, cnt_part = pl.pallas_call(
        kernel,
        out_shape=(jax.ShapeDtypeStruct((n_split, num_batch_blocks, 1, tn), jnp.float32),
                   jax.ShapeDtypeStruct((n_split, num_batch_blocks, 1, tn), jnp.float32)),
        grid=(n_split, num_batch_blocks, cps),
        in_specs=[
            pl.BlockSpec((BN, C, tn), lambda s, nb, j: (nb, 0, chunk_of(s, j))),
            pl.BlockSpec((BN, 1, tn), lambda s, nb, j: (nb, 0, chunk_of(s, j))),
        ],
        out_specs=(
            pl.BlockSpec((None, None, 1, tn), lambda s, nb, j: (s, nb, 0, 0)),
            pl.BlockSpec((None, None, 1, tn), lambda s, nb, j: (s, nb, 0, 0)),
        ),
        compiler_params=pltpu.CompilerParams(
            dimension_semantics=("parallel", "parallel", "arbitrary"),
            vmem_limit_bytes=vmem_limit,
        ),
    )(probs, tgt)

    # weight=None, size_average=True -> mean over non-ignored pixels.
    # Final tiny reduction of the lane-wide partials happens in XLA.
    return jnp.sum(sum_part) / jnp.sum(cnt_part)


def _reference(inputs, targets, ignore_index=255):
    log_p = jnp.log(inputs.astype(jnp.float32))
    t = targets.astype(jnp.int32)
    valid = t != ignore_index
    safe_t = jnp.where(valid, t, 0)
    gathered = jnp.take_along_axis(log_p, safe_t[:, None, :, :], axis=1)[:, 0]
    loss_sum = jnp.sum(jnp.where(valid, -gathered, 0.0))
    return loss_sum / jnp.sum(valid.astype(jnp.float32))


if __name__ == "__main__":
    key = jax.random.PRNGKey(0)
    N, C, H, W = 2, 4, 16, 16
    k1, k2, k3 = jax.random.split(key, 3)

    logits = jax.random.normal(k1, (N, C, H, W), dtype=jnp.float32)
    probs = jax.nn.softmax(logits, axis=1)          # module expects probabilities
    targets = jax.random.randint(k2, (N, H, W), 0, C).astype(jnp.int32)
    ignore = jax.random.bernoulli(k3, 0.1, (N, H, W))
    targets = jnp.where(ignore, 255, targets)

    loss = cross_entropy_loss_2d(probs, targets)
    jax.block_until_ready(loss)

    ref = _reference(probs, targets)
    np.testing.assert_allclose(np.asarray(loss), np.asarray(ref),
                               rtol=1e-5, atol=1e-6)
    print("KERNEL_OK")
</pallas_src>

<mosaic_0001>
module attributes {stable_mosaic.version = 11 : i64} {
  func.func @_nll_kernel(%arg0: i32, %arg1: i32, %arg2: i32, %arg3: memref<2x4x256xf32, #tpu.memory_space<vmem>>, %arg4: memref<2x1x256xi32, #tpu.memory_space<vmem>>, %arg5: memref<1x1x1x256xf32, #tpu.memory_space<vmem>>, %arg6: memref<1x1x1x256xf32, #tpu.memory_space<vmem>>) attributes {dimension_semantics = [#tpu.dimension_semantics<parallel>, #tpu.dimension_semantics<parallel>, #tpu.dimension_semantics<arbitrary>], iteration_bounds = array<i64: 1, 1, 1>, scalar_prefetch = 0 : i64, scratch_operands = 0 : i64, tpu.core_type = #tpu.core_type<tc>, window_params = [{transform_indices = @transform_0, window_bounds = array<i64: 2, 4, 256>}, {transform_indices = @transform_1, window_bounds = array<i64: 2, 1, 256>}, {transform_indices = @transform_2, window_bounds = array<i64: 1, 1, 1, 256>}, {transform_indices = @transform_3, window_bounds = array<i64: 1, 1, 1, 256>}]} {
    %c0_i32 = arith.constant 0 : i32
    %0 = arith.cmpi eq, %arg2, %c0_i32 : i32
    %1 = arith.extui %0 : i1 to i32
    %c0_i32_0 = arith.constant 0 : i32
    %2 = arith.cmpi ne, %1, %c0_i32_0 : i32
    scf.if %2 {
      %cst_29 = arith.constant 0.000000e+00 : f32
      %36 = vector.broadcast %cst_29 : f32 to vector<1x256xf32>
      %c0_30 = arith.constant 0 : index
      %c0_31 = arith.constant 0 : index
      %c0_32 = arith.constant 0 : index
      %c0_33 = arith.constant 0 : index
      %37 = vector.load %arg5[%c0_30, %c0_31, %c0_32, %c0_33] : memref<1x1x1x256xf32, #tpu.memory_space<vmem>>, vector<1x1x1x256xf32>
      %38 = vector.shape_cast %37 : vector<1x1x1x256xf32> to vector<1x256xf32>
      %39 = vector.shape_cast %36 : vector<1x256xf32> to vector<1x1x1x256xf32>
      tpu.vector_store %arg5[%c0_30, %c0_31, %c0_32, %c0_33], %39 {strides = array<i32>} : memref<1x1x1x256xf32, #tpu.memory_space<vmem>>, vector<1x1x1x256xf32>,
      %cst_34 = arith.constant 0.000000e+00 : f32
      %40 = vector.broadcast %cst_34 : f32 to vector<1x256xf32>
      %c0_35 = arith.constant 0 : index
      %c0_36 = arith.constant 0 : index
      %c0_37 = arith.constant 0 : index
      %c0_38 = arith.constant 0 : index
      %41 = vector.load %arg6[%c0_35, %c0_36, %c0_37, %c0_38] : memref<1x1x1x256xf32, #tpu.memory_space<vmem>>, vector<1x1x1x256xf32>
      %42 = vector.shape_cast %41 : vector<1x1x1x256xf32> to vector<1x256xf32>
      %43 = vector.shape_cast %40 : vector<1x256xf32> to vector<1x1x1x256xf32>
      tpu.vector_store %arg6[%c0_35, %c0_36, %c0_37, %c0_38], %43 {strides = array<i32>} : memref<1x1x1x256xf32, #tpu.memory_space<vmem>>, vector<1x1x1x256xf32>,
    } else {
    }
    %c0 = arith.constant 0 : index
    %c0_1 = arith.constant 0 : index
    %c0_2 = arith.constant 0 : index
    %3 = vector.load %arg3[%c0, %c0_1, %c0_2] : memref<2x4x256xf32, #tpu.memory_space<vmem>>, vector<2x4x256xf32>
    %c0_3 = arith.constant 0 : index
    %c0_4 = arith.constant 0 : index
    %c0_5 = arith.constant 0 : index
    %4 = vector.load %arg4[%c0_3, %c0_4, %c0_5] : memref<2x1x256xi32, #tpu.memory_space<vmem>>, vector<2x1x256xi32>
    %5 = tpu.iota {dimensions = array<i32: 1>} : vector<2x4x256xi32>
    %6 = vector.broadcast %4 : vector<2x1x256xi32> to vector<2x4x256xi32>
    %7 = arith.cmpi eq, %5, %6 : vector<2x4x256xi32>
    %cst = arith.constant 0.000000e+00 : f32
    %8 = vector.broadcast %cst : f32 to vector<2x4x256xf32>
    %9 = arith.select %7, %3, %8 : vector<2x4x256xi1>, vector<2x4x256xf32>
    %cst_6 = arith.constant dense<0.000000e+00> : vector<2x256xf32>
    %10 = vector.multi_reduction <add>, %9, %cst_6 [1] : vector<2x4x256xf32> to vector<2x256xf32>
    %11 = vector.shape_cast %10 : vector<2x256xf32> to vector<2x1x256xf32>
    %12 = math.log %11 : vector<2x1x256xf32>
    %cst_7 = arith.constant 0.000000e+00 : f32
    %13 = vector.broadcast %cst_7 : f32 to vector<2x1x256xf32>
    %14 = arith.subf %13, %12 : vector<2x1x256xf32>
    %c255_i32 = arith.constant 255 : i32
    %15 = vector.broadcast %c255_i32 : i32 to vector<2x1x256xi32>
    %16 = arith.cmpi ne, %4, %15 : vector<2x1x256xi32>
    %c0_8 = arith.constant 0 : index
    %c0_9 = arith.constant 0 : index
    %c0_10 = arith.constant 0 : index
    %c0_11 = arith.constant 0 : index
    %17 = vector.load %arg5[%c0_8, %c0_9, %c0_10, %c0_11] : memref<1x1x1x256xf32, #tpu.memory_space<vmem>>, vector<1x1x1x256xf32>
    %18 = vector.shape_cast %17 : vector<1x1x1x256xf32> to vector<1x256xf32>
    %cst_12 = arith.constant 0.000000e+00 : f32
    %19 = vector.broadcast %cst_12 : f32 to vector<2x1x256xf32>
    %20 = arith.select %16, %14, %19 : vector<2x1x256xi1>, vector<2x1x256xf32>
    %cst_13 = arith.constant dense<0.000000e+00> : vector<1x256xf32>
    %21 = vector.multi_reduction <add>, %20, %cst_13 [0] : vector<2x1x256xf32> to vector<1x256xf32>
    %22 = arith.addf %18, %21 : vector<1x256xf32>
    %c0_14 = arith.constant 0 : index
    %c0_15 = arith.constant 0 : index
    %c0_16 = arith.constant 0 : index
    %c0_17 = arith.constant 0 : index
    %23 = vector.load %arg5[%c0_14, %c0_15, %c0_16, %c0_17] : memref<1x1x1x256xf32, #tpu.memory_space<vmem>>, vector<1x1x1x256xf32>
    %24 = vector.shape_cast %23 : vector<1x1x1x256xf32> to vector<1x256xf32>
    %25 = vector.shape_cast %22 : vector<1x256xf32> to vector<1x1x1x256xf32>
    tpu.vector_store %arg5[%c0_14, %c0_15, %c0_16, %c0_17], %25 {strides = array<i32>} : memref<1x1x1x256xf32, #tpu.memory_space<vmem>>, vector<1x1x1x256xf32>,
    %c0_18 = arith.constant 0 : index
    %c0_19 = arith.constant 0 : index
    %c0_20 = arith.constant 0 : index
    %c0_21 = arith.constant 0 : index
    %26 = vector.load %arg6[%c0_18, %c0_19, %c0_20, %c0_21] : memref<1x1x1x256xf32, #tpu.memory_space<vmem>>, vector<1x1x1x256xf32>
    %27 = vector.shape_cast %26 : vector<1x1x1x256xf32> to vector<1x256xf32>
    %cst_22 = arith.constant 1.000000e+00 : f32
    %cst_23 = arith.constant 0.000000e+00 : f32
    %28 = vector.broadcast %cst_22 : f32 to vector<2x1x256xf32>
    %29 = vector.broadcast %cst_23 : f32 to vector<2x1x256xf32>
    %30 = arith.select %16, %28, %29 : vector<2x1x256xi1>, vector<2x1x256xf32>
    %cst_24 = arith.constant dense<0.000000e+00> : vector<1x256xf32>
    %31 = vector.multi_reduction <add>, %30, %cst_24 [0] : vector<2x1x256xf32> to vector<1x256xf32>
    %32 = arith.addf %27, %31 : vector<1x256xf32>
    %c0_25 = arith.constant 0 : index
    %c0_26 = arith.constant 0 : index
    %c0_27 = arith.constant 0 : index
    %c0_28 = arith.constant 0 : index
    %33 = vector.load %arg6[%c0_25, %c0_26, %c0_27, %c0_28] : memref<1x1x1x256xf32, #tpu.memory_space<vmem>>, vector<1x1x1x256xf32>
    %34 = vector.shape_cast %33 : vector<1x1x1x256xf32> to vector<1x256xf32>
    %35 = vector.shape_cast %32 : vector<1x256xf32> to vector<1x1x1x256xf32>
    tpu.vector_store %arg6[%c0_25, %c0_26, %c0_27, %c0_28], %35 {strides = array<i32>} : memref<1x1x1x256xf32, #tpu.memory_space<vmem>>, vector<1x1x1x256xf32>,
    return
  }
  func.func @transform_0(%arg0: i32, %arg1: i32, %arg2: i32) -> (i32, i32, i32) {
    %c1_i32 = arith.constant 1 : i32
    %0 = arith.muli %arg0, %c1_i32 : i32
    %1 = arith.addi %0, %arg2 : i32
    %c0_i32 = arith.constant 0 : i32
    %c0_i32_0 = arith.constant 0 : i32
    return %arg1, %c0_i32, %1 : i32, i32, i32
  }
  func.func @transform_1(%arg0: i32, %arg1: i32, %arg2: i32) -> (i32, i32, i32) {
    %c1_i32 = arith.constant 1 : i32
    %0 = arith.muli %arg0, %c1_i32 : i32
    %1 = arith.addi %0, %arg2 : i32
    %c0_i32 = arith.constant 0 : i32
    %c0_i32_0 = arith.constant 0 : i32
    return %arg1, %c0_i32, %1 : i32, i32, i32
  }
  func.func @transform_2(%arg0: i32, %arg1: i32, %arg2: i32) -> (i32, i32, i32, i32) {
    %c0_i32 = arith.constant 0 : i32
    %c0_i32_0 = arith.constant 0 : i32
    %c0_i32_1 = arith.constant 0 : i32
    return %arg0, %arg1, %c0_i32, %c0_i32_0 : i32, i32, i32, i32
  }
  func.func @transform_3(%arg0: i32, %arg1: i32, %arg2: i32) -> (i32, i32, i32, i32) {
    %c0_i32 = arith.constant 0 : i32
    %c0_i32_0 = arith.constant 0 : i32
    %c0_i32_1 = arith.constant 0 : i32
    return %arg0, %arg1, %c0_i32, %c0_i32_0 : i32, i32, i32, i32
  }
}

</mosaic_0001>

<bundles_post_ra>
// kernel: tpu_custom_call.1
= control target key start
LH: loop header
LB: loop body
LE: loop exit
PB: predicated region body
PF: predicated region fallthrough
CT: control target
= control target key end

     0   :  { %9 = vsyncpa [#allocation3], 0  ;;  %s588_s0 = inlined_call_operand.hbm [shape: f32[2,4,256], index: 0, kind: input, shape index: {}]   ;;  %s589_s1 = inlined_call_operand.hbm [shape: s32[2,1,256], index: 1, kind: input, shape index: {}]   ;;  %s590_s2 = inlined_call_operand.hbm [shape: f32[1,1,1,256], index: 2, kind: output, shape index: {0}]   ;;  %s591_s3 = inlined_call_operand.hbm [shape: f32[1,1,1,256], index: 3, kind: output, shape index: {1}]  }
   0x1   :  { %10 = vsyncpa [#allocation6], 0 }
   0x2   :  { %11 = vsyncpa [#allocation4], 0 }
   0x3   :  { %12 = vsyncpa [#allocation9], 0  ;;  %s433_s12 = smov [#allocation2]   ;;  %s337_s16 = scalar_lea.hbm %s588_s0, 256 }
   0x4   :  { %s22_s13 = sshll.u32 %s433_s12, 4  ;;  %p338_p0 = scmp.ne.s32.totalorder %s588_s0, %s337_s16  ;;  %s23_s13 = int_to_ptr.vmem [resolvable:$true] %s22_s13 }
   0x5   :  { %p341_p1 = scmp.lt.u32.totalorder %s337_s16, %s588_s0 }
   0x7   :  { %p343_p2 = pnand %p341_p1, %p338_p0 }
   0x9   :  { %346 = shalt.err (!%p343_p2)
}
   0xa   :  { %s347_s21 = scalar_lea.vmem %s23_s13, 256  ;;  %p352_p4 = scmp.lt.s32.totalorder %s23_s13, %s23_s13 }
   0xb   :  { %p348_p3 = scmp.ne.s32.totalorder %s23_s13, %s347_s21  ;;  %p353_p5 = scmp.lt.s32.totalorder %s347_s21, %s347_s21 }
   0xd   :  { %p354_p6 = por %p353_p5, %p352_p4 }
   0xf   :  { %p355_p7 = pnand %p354_p6, %p348_p3 }
  0x11   :  { %358 = shalt.err (!%p355_p7)
}
  0x12   :  { %s434_s22 = smov 128   ;;  %s435_s23 = smov 8  }
  0x13   :  { %28 = dma.hbm_to_vmem [thread:$0]  %s588_s0, 256, %s23_s13, [#allocation3], %s434_s22, %s434_s22, %s435_s23  }
  0x14   :  { %s436_s26 = smov [#allocation5]   ;;  %s359_s30 = scalar_lea.hbm %s589_s1, 64 }
  0x15   :  { %s38_s27 = sshll.u32 %s436_s26, 4  ;;  %p360_p8 = scmp.ne.s32.totalorder %s589_s1, %s359_s30  ;;  %s39_s27 = int_to_ptr.vmem [resolvable:$true] %s38_s27 }
  0x16   :  { %p363_p9 = scmp.lt.u32.totalorder %s359_s30, %s589_s1 }
  0x18   :  { %p365_p10 = pnand %p363_p9, %p360_p8 }
  0x1a   :  { %368 = shalt.err (!%p365_p10)
}
  0x1b   :  { %s369_s8 = scalar_lea.vmem %s39_s27, 64  ;;  %p374_p12 = scmp.lt.s32.totalorder %s39_s27, %s39_s27 }
  0x1c   :  { %p370_p11 = scmp.ne.s32.totalorder %s39_s27, %s369_s8  ;;  %p375_p13 = scmp.lt.s32.totalorder %s369_s8, %s369_s8 }
  0x1e   :  { %p376_p0 = por %p375_p13, %p374_p12 }
  0x20   :  { %p377_p1 = pnand %p376_p0, %p370_p11 }
  0x22   :  { %380 = shalt.err (!%p377_p1)
}
  0x23   :  { %s437_s0 = smov 32   ;;  %s438_s9 = smov 2  }
  0x24   :  { %44 = dma.hbm_to_vmem [thread:$0]  %s589_s1, 64, %s39_s27, [#allocation6], %s437_s0, %s437_s0, %s438_s9  }
  0x25   :  { %425 = dma.done.wait [#allocation3], 256  }
  0x26   :  { %426 = vsyncadd [#allocation3], 4294967040 }
  0x27   :  { %427 = dma.done.wait [#allocation6], 64  }
  0x28   :  { %428 = vsyncadd [#allocation6], 4294967232  ;;  %v59_v0 = vlaneseq  ;;  %v439_v3 = vmov 0.0   ;;  %v440_v4 = vmov 1966171168   ;;  %v65_v8 = vld [vmem:[#allocation2] sm:$0xff] }
  0x29   :  { %v151_v5 = vunpack.c.l.s4 %v440_v4  ;;  %v66_v9 = vld [vmem:[#allocation2 + $0x8] sm:$0xff]  ;;  %v503_v10 = vld [vmem:[#allocation5] sm:$0x3]  ;;  %vm101_vm1 = vcmask 1043456   ;;  %vm205_vm2 = vcmask 1040384   ;;  %v93_v15 = vcombine.high %v65_v8, %v65_v8  ;;  %s441_s1 = smov [#allocation8]  }
  0x2a   :  { %vm487_vm0 = vcmp.lt.s32.totalorder %v59_v0, 256  ;;  %v491_v2 = vshrl.u32 %v59_v0, 7  ;;  %v505_v12 = vld [vmem:[#allocation5 + $0x2] sm:$0x3]  ;;  %v94_v16 = vcombine.high %v66_v9, %v66_v9  ;;  %vm142_vm3 = vcmp.ne.s32.totalorder %v503_v10, 255  ;;  %s303_s12 = sshll.u32 %s441_s1, 4  ;;  %s304_s12 = int_to_ptr.vmem [resolvable:$true] %s303_s12 }
  0x2b   :  { %63 = vst.msk [vmem:[#allocation7] sm:$0x3] %vm487_vm0, %v439_v3  ;;  %64 = vst.msk [vmem:[#allocation8] sm:$0x3] %vm487_vm0, %v439_v3  ;;  %v152_v11 = vunpack.c.0.s8 %v151_v5  ;;  %vm143_vm4 = vcmp.ne.s32.totalorder %v505_v12, 255  ;;  %v237_v19 = vsel %vm142_vm3, 1.0, %v439_v3  ;;  %p386_p3 = scmp.lt.s32.totalorder %s304_s12, %s304_s12 }
  0x2c   :  { %v498_v6 = vsub.s32 0, %v491_v2  ;;  %v501_v7 = vsub.s32 1, %v491_v2  ;;  %v238_v20 = vsel %vm143_vm4, 1.0, %v439_v3  ;;  %s381_s13 = scalar_lea.vmem %s304_s12, 32 }
  0x2d   :  { %v538_v55 = vsub.s32 %v152_v11, %v491_v2  ;;  %p382_p2 = scmp.ne.s32.totalorder %s304_s12, %s381_s13  ;;  %p387_p4 = scmp.lt.s32.totalorder %s381_s13, %s381_s13 }
  0x2e   :  { %v74_v13 = vrot.slane %v503_v10, %v498_v6  ;;  %v78_v14 = vrot.slane %v503_v10, %v501_v7  ;;  %v82_v17 = vrot.slane %v505_v12, %v498_v6  ;;  %v86_v18 = vrot.slane %v505_v12, %v501_v7 }
  0x2f   :  { %v244_v33 = vrot.slane %v237_v19, %v498_v6  ;;  %v248_v34 = vrot.slane %v237_v19, %v501_v7  ;;  %v252_v37 = vrot.slane %v238_v20, %v498_v6  ;;  %v256_v38 = vrot.slane %v238_v20, %v501_v7  ;;  %p388_p5 = por %p387_p4, %p386_p3 }
  0x30   :  { %vm87_vm5 = vcmp.eq.s32.totalorder %v491_v2, %v74_v13  ;;  %vm88_vm6 = vcmp.eq.s32.totalorder %v491_v2, %v78_v14  ;;  %vm89_vm7 = vcmp.eq.s32.totalorder %v491_v2, %v82_v17  ;;  %vm90_vm8 = vcmp.eq.s32.totalorder %v491_v2, %v86_v18 }
  0x31   :  { %v97_v21 = vsel %vm87_vm5, %v65_v8, 0.0  ;;  %v98_v22 = vsel %vm88_vm6, %v93_v15, 0.0  ;;  %v99_v23 = vsel %vm89_vm7, %v66_v9, 0.0  ;;  %v100_v24 = vsel %vm90_vm8, %v94_v16, 0.0  ;;  %p389_p6 = pnand %p388_p5, %p382_p2 }
  0x32   :  { %v102_v25 = vsel %vm101_vm1, %v97_v21, 0.0  ;;  %v109_v26 = vsel %vm101_vm1, %v98_v22, 0.0  ;;  %v116_v29 = vsel %vm101_vm1, %v99_v23, 0.0  ;;  %v123_v30 = vsel %vm101_vm1, %v100_v24, 0.0  ;;  %v236_v0 = vld [vmem:[#allocation8] sm:$0x3] }
  0x33   :  { %v103_v27 = vrot.slane %v102_v25, 4  ;;  %v110_v28 = vrot.slane %v109_v26, 4  ;;  %v117_v31 = vrot.slane %v116_v29, 4  ;;  %v124_v32 = vrot.slane %v123_v30, 4 }
  0x34   :  { %v261_v41 = vsel %vm205_vm2, %v244_v33, 0.0  ;;  %v264_v42 = vsel %vm205_vm2, %v248_v34, 0.0  ;;  %v262_v45 = vsel %vm205_vm2, %v252_v37, 0.0  ;;  %v265_v46 = vsel %vm205_vm2, %v256_v38, 0.0 }
  0x35   :  { %v104_v35 = vadd.f32 %v103_v27, %v102_v25  ;;  %v111_v36 = vadd.f32 %v110_v28, %v109_v26  ;;  %v118_v39 = vadd.f32 %v117_v31, %v116_v29  ;;  %v125_v40 = vadd.f32 %v124_v32, %v123_v30 }
  0x36   :  { %v263_v49 = vadd.f32 %v262_v45, %v261_v41  ;;  %v266_v50 = vadd.f32 %v265_v46, %v264_v42 }
  0x37   :  { %v105_v43 = vrot.slane %v104_v35, 2  ;;  %v112_v44 = vrot.slane %v111_v36, 2  ;;  %v119_v47 = vrot.slane %v118_v39, 2  ;;  %v126_v48 = vrot.slane %v125_v40, 2 }
  0x38   :  { %v269_v56 = vcombine.low %v263_v49, %v266_v50 }
  0x39   :  { %v106_v51 = vadd.f32 %v105_v43, %v104_v35  ;;  %v113_v52 = vadd.f32 %v112_v44, %v111_v36  ;;  %v120_v53 = vadd.f32 %v119_v47, %v118_v39  ;;  %v127_v54 = vadd.f32 %v126_v48, %v125_v40 }
  0x3a   :  { %v276_v61 = vrot.slane %v269_v56, %v538_v55 }
  0x3b   :  { %v107_v57 = vrot.slane %v106_v51, 1  ;;  %v114_v58 = vrot.slane %v113_v52, 1  ;;  %v121_v59 = vrot.slane %v120_v53, 1  ;;  %v128_v60 = vrot.slane %v127_v54, 1 }
  0x3c   :  { %v283_v5 = vrot.slane %v276_v61, %v538_v55 }
  0x3d   :  { %v108_v62 = vadd.f32 %v107_v57, %v106_v51  ;;  %v115_v63 = vadd.f32 %v114_v58, %v113_v52  ;;  %v122_v3 = vadd.f32 %v121_v59, %v120_v53  ;;  %v129_v4 = vadd.f32 %v128_v60, %v127_v54 }
  0x3e   :  { %v285_v2 = vadd.f32 %v283_v5, %v236_v0 }
  0x3f   :  { %329 = vlog2.f32 %v108_v62 }
  0x40   :  { %331 = vlog2.f32 %v115_v63  ;;  %286 = vst.msk [vmem:[#allocation8] sm:$0x3] %vm487_vm0, %v285_v2 }
  0x41   :  { %333 = vlog2.f32 %v122_v3 }
  0x42   :  { %335 = vlog2.f32 %v129_v4 }
  0x43   :  { %392 = shalt.err (!%p389_p6)
}
  0x44   :  { %s393_s16 = scalar_lea.hbm %s591_s3, 32 }
  0x45   :  { %p394_p7 = scmp.ne.s32.totalorder %s591_s3, %s393_s16  ;;  %p397_p8 = scmp.lt.u32.totalorder %s393_s16, %s591_s3 }
  0x47   :  { %p399_p9 = pnand %p397_p8, %p394_p7 }
  0x49   :  { %402 = shalt.err (!%p399_p9)
}
  0x4a   :  { %306 = dma.vmem_to_hbm [thread:$0]  %s304_s12, 32, %s591_s3, [#allocation9]   ;;  %v330_v8 = vpop.eup %329  ;;  %v144_v41 = vld [vmem:[#allocation7] sm:$0x3] }
  0x4b   :  { %v332_v9 = vpop.eup %331  ;;  %v131_v11 = vmul.f32 0.6931472, %v330_v8  ;;  %s442_s3 = smov [#allocation7]  }
  0x4c   :  { %v334_v13 = vpop.eup %333  ;;  %v133_v14 = vmul.f32 0.6931472, %v332_v9  ;;  %s293_s23 = sshll.u32 %s442_s3, 4  ;;  %s294_s23 = int_to_ptr.vmem [resolvable:$true] %s293_s23 }
  0x4d   :  { %v336_v15 = vpop.eup %335  ;;  %v135_v16 = vmul.f32 0.6931472, %v334_v13  ;;  %v138_v17 = vsub.f32 0.0, %v131_v11  ;;  %s403_s24 = scalar_lea.vmem %s294_s23, 32  ;;  %p408_p11 = scmp.lt.s32.totalorder %s294_s23, %s294_s23 }
  0x4e   :  { %v137_v18 = vmul.f32 0.6931472, %v336_v15  ;;  %v139_v19 = vsub.f32 0.0, %v133_v14  ;;  %p404_p10 = scmp.ne.s32.totalorder %s294_s23, %s403_s24  ;;  %p409_p12 = scmp.lt.s32.totalorder %s403_s24, %s403_s24 }
  0x4f   :  { %v140_v20 = vsub.f32 0.0, %v135_v16 }
  0x50   :  { %v141_v21 = vsub.f32 0.0, %v137_v18  ;;  %v149_v22 = vcombine.low %v138_v17, %v139_v19  ;;  %p410_p13 = por %p409_p12, %p408_p11 }
  0x52   :  { %v156_v23 = vrot.slane %v149_v22, %v538_v55  ;;  %v164_v24 = vcombine.low %v140_v20, %v141_v21  ;;  %p411_p0 = pnand %p410_p13, %p404_p10 }
  0x54   :  { %v163_v25 = vrot.slane %v156_v23, %v538_v55  ;;  %v171_v26 = vrot.slane %v164_v24, %v538_v55 }
  0x56   :  { %v178_v27 = vrot.slane %v171_v26, %v538_v55  ;;  %v181_v28 = vsel %vm142_vm3, %v163_v25, 0.0 }
  0x57   :  { %v188_v29 = vrot.slane %v181_v28, %v498_v6  ;;  %v192_v30 = vrot.slane %v181_v28, %v501_v7 }
  0x58   :  { %v182_v31 = vsel %vm143_vm4, %v178_v27, 0.0 }
  0x59   :  { %v196_v32 = vrot.slane %v182_v31, %v498_v6  ;;  %v200_v33 = vrot.slane %v182_v31, %v501_v7  ;;  %v206_v34 = vsel %vm205_vm2, %v188_v29, 0.0  ;;  %v209_v35 = vsel %vm205_vm2, %v192_v30, 0.0 }
  0x5b   :  { %v207_v36 = vsel %vm205_vm2, %v196_v32, 0.0  ;;  %v210_v10 = vsel %vm205_vm2, %v200_v33, 0.0 }
  0x5c   :  { %v208_v37 = vadd.f32 %v207_v36, %v206_v34  ;;  %v211_v38 = vadd.f32 %v210_v10, %v209_v35 }
  0x5e   :  { %v214_v39 = vcombine.low %v208_v37, %v211_v38 }
  0x60   :  { %v221_v40 = vrot.slane %v214_v39, %v538_v55 }
  0x62   :  { %v228_v6 = vrot.slane %v221_v40, %v538_v55 }
  0x64   :  { %v230_v12 = vadd.f32 %v228_v6, %v144_v41 }
  0x66   :  { %235 = vst.msk [vmem:[#allocation7] sm:$0x3] %vm487_vm0, %v230_v12 }
  0x67   :  { %414 = shalt.err (!%p411_p0)
}
  0x68   :  { %s415_s27 = scalar_lea.hbm %s590_s2, 32 }
  0x69   :  { %p416_p1 = scmp.ne.s32.totalorder %s590_s2, %s415_s27  ;;  %p419_p2 = scmp.lt.u32.totalorder %s415_s27, %s590_s2 }
  0x6b   :  { %p421_p3 = pnand %p419_p2, %p416_p1 }
  0x6d   :  { %424 = shalt.err (!%p421_p3)
}
  0x6e   :  { %296 = dma.vmem_to_hbm [thread:$0]  %s294_s23, 32, %s590_s2, [#allocation4]  }
  0x6f   :  { %429 = dma.done.wait [#allocation4], 32  }
  0x70   :  { %430 = vsyncadd [#allocation4], 4294967264 }
  0x71   :  { %431 = dma.done.wait [#allocation9], 32  }
  0x72   :  { %432 = vsyncadd [#allocation9], 4294967264 }
  0x73   :  { %313 = vsyncpa [#allocation3], 1 }
  0x74   :  { %314 = vsyncpa [#allocation6], 1 }
  0x75   :  { %315 = vsyncpa [#allocation4], 1 }
  0x76   :  { %316 = vsyncpa [#allocation9], 1 }

</bundles_post_ra>
